<compile_context>
chip_gen: v6e
topology: v6e:2x2x1
jax: 0.10.0
libtpu: 0.0.40
codegen_flags: <defaults>
</compile_context>

<pallas_src>
import jax
import jax.numpy as jnp
from jax.experimental import pallas as pl
from jax.experimental.pallas import tpu as pltpu


# ---------------------------------------------------------------------------
# Kernels
# ---------------------------------------------------------------------------

def _resident_kernel(x_ref, w1t_ref, w2t_ref, o_ref):
    """relu(x @ W1^T) @ W2^T with both (pre-transposed) weights resident in VMEM.

    x_ref:   (TN, D_in_p)    bf16
    w1t_ref: (D_in_p, H_p)   bf16 (constant block -> DMA'd once, stays resident)
    w2t_ref: (H_p, D_out_p)  bf16 (constant block -> DMA'd once, stays resident)
    o_ref:   (TN, D_out_p)   out dtype
    """
    h = jnp.dot(x_ref[...], w1t_ref[...], preferred_element_type=jnp.float32)
    h = jnp.maximum(h, 0.0).astype(w2t_ref.dtype)           # ReLU (= .clamp(min=0))
    y = jnp.dot(h, w2t_ref[...], preferred_element_type=jnp.float32)
    o_ref[...] = y.astype(o_ref.dtype)


def _h_tiled_kernel(x_ref, w1t_ref, w2t_ref, o_ref, acc_ref):
    """Streaming-weights variant for layers whose full weights don't fit in VMEM.

    grid = (N tiles, H tiles); the H axis is a reduction for the second matmul,
    accumulated in an f32 VMEM scratch (init/finalize via pl.when).  ReLU is
    elementwise, so applying it per H block is exact.
    """
    hi = pl.program_id(1)

    @pl.when(hi == 0)
    def _():
        acc_ref[...] = jnp.zeros_like(acc_ref)

    h = jnp.dot(x_ref[...], w1t_ref[...], preferred_element_type=jnp.float32)
    h = jnp.maximum(h, 0.0).astype(w2t_ref.dtype)
    acc_ref[...] += jnp.dot(h, w2t_ref[...], preferred_element_type=jnp.float32)

    @pl.when(hi == pl.num_programs(1) - 1)
    def _():
        o_ref[...] = acc_ref[...].astype(o_ref.dtype)


# ---------------------------------------------------------------------------
# Wrapper helpers
# ---------------------------------------------------------------------------

def _round_up(v, m):
    return (v + m - 1) // m * m


def _pad_dim(d):
    # Lane-dense padding.  Large dims get 256-multiples (v6e/v7x MXU is 2x256^2);
    # small dims stay at 128 (native on v5e, avoids over-padding tiny layers).
    return _round_up(d, 256) if d >= 256 else _round_up(d, 128)


def _vmem_budget_bytes():
    """~75% of physical VMEM per TensorCore (leave headroom for compiler scratch)."""
    try:
        cap = pltpu.get_tpu_info().vmem_capacity_bytes
    except Exception:
        cap = 64 * 1024 * 1024          # conservative (v7x-sized) fallback
    return int(cap) * 3 // 4


def _choose_tiles(n_pad, d_in_p, h_p, d_out_p, out_itemsize, budget, tn_hint, h_tile):
    """Pick (TN, TH, resident).  resident=True -> both full weights live in VMEM."""
    if h_tile is not None and h_p % h_tile != 0:
        raise ValueError(f"h_tile={h_tile} must divide padded H={h_p}")

    tn_cands = []
    for t in (tn_hint, 512, 256, 128, 64, 32, 16):
        t = min(_round_up(int(t), 16), n_pad)
        if t > 0 and t not in tn_cands:
            tn_cands.append(t)
    tn_cands.sort(reverse=True)

    w_bytes = (d_in_p * h_p + h_p * d_out_p) * 2            # bf16, single-buffered

    def resident_fit(tn):
        return (w_bytes
                + 2 * tn * d_in_p * 2                       # x double-buffer (bf16)
                + 2 * tn * d_out_p * out_itemsize           # out double-buffer
                + tn * h_p * (4 + 2)                        # f32 h + bf16 copy
                + tn * d_out_p * 4)                         # f32 y before cast

    if h_tile is None:                                      # prefer resident weights
        for tn in tn_cands:
            if resident_fit(tn) <= budget:
                return tn, None, True

    th_cands = [h_tile] if h_tile is not None else [1024, 512, 256, 128]

    def htiled_fit(tn, th):
        return (2 * d_in_p * th * 2 + 2 * th * d_out_p * 2  # streamed weight blocks
                + 2 * tn * d_in_p * 2
                + 2 * tn * d_out_p * out_itemsize
                + tn * d_out_p * 4                          # f32 accumulator scratch
                + tn * th * (4 + 2))                        # f32 h + bf16 copy

    for tn in tn_cands:
        for th in th_cands:
            if th is None or h_p % th != 0:
                continue
            if htiled_fit(tn, th) <= budget:
                return tn, th, False

    return tn_cands[-1], (h_tile if h_tile is not None else 128), False


def _call_resident(x_p, w1t, w2t, tn, grid_n, out_dtype, budget, cost):
    n_pad, d_in_p = x_p.shape
    h_p, d_out_p = w2t.shape

    def build(single_buffer_weights):
        w_kw = dict(pipeline_mode=pl.Buffered(1)) if single_buffer_weights else {}
        return pl.pallas_call(
            _resident_kernel,
            out_shape=jax.ShapeDtypeStruct((n_pad, d_out_p), out_dtype),
            grid=(grid_n,),
            in_specs=[
                pl.BlockSpec((tn, d_in_p), lambda i: (i, 0)),       # x tile per step
                pl.BlockSpec((d_in_p, h_p), lambda i: (0, 0), **w_kw),   # W1^T resident
                pl.BlockSpec((h_p, d_out_p), lambda i: (0, 0), **w_kw),  # W2^T resident
            ],
            out_specs=pl.BlockSpec((tn, d_out_p), lambda i: (i, 0)),
            compiler_params=pltpu.CompilerParams(
                dimension_semantics=("parallel",),          # shard N across TCs (v7x)
                vmem_limit_bytes=int(budget)),
            cost_estimate=cost,
        )

    try:
        return build(True)(x_p, w1t, w2t)
    except Exception:
        # pipeline_mode=pl.Buffered(1) not supported on this jax build: fall back to
        # default double-buffered weights (2x weight VMEM, still correct).
        return build(False)(x_p, w1t, w2t)


def _call_h_tiled(x_p, w1t, w2t, tn, th, grid_n, out_dtype, budget, cost):
    n_pad, d_in_p = x_p.shape
    h_p, d_out_p = w2t.shape
    return pl.pallas_call(
        _h_tiled_kernel,
        out_shape=jax.ShapeDtypeStruct((n_pad, d_out_p), out_dtype),
        grid=(grid_n, h_p // th),
        in_specs=[
            pl.BlockSpec((tn, d_in_p), lambda i, h: (i, 0)),   # x tile, resident over H
            pl.BlockSpec((d_in_p, th), lambda i, h: (0, h)),   # W1^T column block
            pl.BlockSpec((th, d_out_p), lambda i, h: (h, 0)),  # W2^T row block
        ],
        out_specs=pl.BlockSpec((tn, d_out_p), lambda i, h: (i, 0)),
        scratch_shapes=[pltpu.VMEM((tn, d_out_p), jnp.float32)],
        compiler_params=pltpu.CompilerParams(
            dimension_semantics=("parallel", "arbitrary"),
            vmem_limit_bytes=int(budget)),
        cost_estimate=cost,
    )(x_p, w1t, w2t)


# ---------------------------------------------------------------------------
# Public API
# ---------------------------------------------------------------------------

def prepare_weights(w1, w2, compute_dtype=jnp.bfloat16):
    """One-time weight repacking: transpose, zero-pad feature dims, cast to bf16.

    Call once per model and reuse the result across forward passes (this is the
    per-call HBM round trip the perf review asked to hoist).

    w1: (H, D_in)   PyTorch Linear(D_in, H, bias=False).weight
    w2: (D_out, H)  PyTorch Linear(H, D_out, bias=False).weight
    """
    H, D_in = w1.shape
    D_out, H2 = w2.shape
    assert H == H2, "w1/w2 hidden dims must match"
    D_in_p, H_p, D_out_p = _pad_dim(D_in), _pad_dim(H), _pad_dim(D_out)
    w1t = jnp.zeros((D_in_p, H_p), compute_dtype).at[:D_in, :H].set(
        w1.T.astype(compute_dtype))
    w2t = jnp.zeros((H_p, D_out_p), compute_dtype).at[:H, :D_out].set(
        w2.T.astype(compute_dtype))
    return w1t, w2t, (D_in, H, D_out)


def two_layer_net_prepared(x, w1t, w2t, dims, *, tn=512, out_dtype=None,
                           h_tile=None, compute_dtype=jnp.bfloat16,
                           vmem_budget=None):
    """Forward pass given pre-formatted (transposed/padded/bf16) weights."""
    D_in, H, D_out = dims
    N = x.shape[0]
    D_in_p, H_p = w1t.shape
    _, D_out_p = w2t.shape

    out_dtype = x.dtype if out_dtype is None else out_dtype
    out_itemsize = jnp.dtype(out_dtype).itemsize
    budget = _vmem_budget_bytes() if vmem_budget is None else int(vmem_budget)

    # Activations: repack (feature zero-pad + bf16 cast) only when needed.  Batch is
    # padded to a multiple of 16 only (bf16 packs 2 rows/sublane); the last batch
    # tile may be ragged (pl.cdiv grid) -- garbage rows are sliced off below, and
    # feature-dim zero padding is kept since padded K columns must be exact zeros.
    N_pad = _round_up(max(N, 1), 16)
    if x.dtype == jnp.dtype(compute_dtype) and x.shape == (N_pad, D_in_p):
        x_p = x
    else:
        x_p = jnp.zeros((N_pad, D_in_p), compute_dtype).at[:N, :D_in].set(
            x.astype(compute_dtype))

    TN, TH, resident = _choose_tiles(N_pad, D_in_p, H_p, D_out_p,
                                     out_itemsize, budget, tn, h_tile)

    # v7x has 2 TensorCores: make sure a "parallel" N axis has >= 2 steps when possible.
    if pl.cdiv(N_pad, TN) == 1 and N_pad >= 32:
        TN = _round_up(pl.cdiv(N_pad, 2), 16)
    grid_n = pl.cdiv(N_pad, TN)

    cost = pl.CostEstimate(
        flops=int(2 * N * (D_in * H + H * D_out)),
        transcendentals=0,
        bytes_accessed=int(x.size * x.dtype.itemsize
                           + (w1t.size + w2t.size) * 2
                           + N * D_out * out_itemsize))

    if resident:
        out = _call_resident(x_p, w1t, w2t, TN, grid_n, out_dtype, budget, cost)
    else:
        out = _call_h_tiled(x_p, w1t, w2t, TN, TH, grid_n, out_dtype, budget, cost)

    return out[:N, :D_out]


def two_layer_net(x, w1, w2, **kwargs):
    """Convenience wrapper matching TwoLayerNet.forward (repacks weights per call;
    prefer prepare_weights + two_layer_net_prepared for repeated calls)."""
    w1t, w2t, dims = prepare_weights(w1, w2, kwargs.get("compute_dtype", jnp.bfloat16))
    return two_layer_net_prepared(x, w1t, w2t, dims, **kwargs)


# ---------------------------------------------------------------------------
# Demo / self-test
# ---------------------------------------------------------------------------

if __name__ == "__main__":
    key = jax.random.PRNGKey(0)
    ks = jax.random.split(key, 8)

    def ref_bf16(x, w1, w2):
        # Reference with the same bf16 rounding the kernel applies (f32 accumulate).
        xb = x.astype(jnp.bfloat16).astype(jnp.float32)
        w1b = w1.astype(jnp.bfloat16).astype(jnp.float32)
        w2b = w2.astype(jnp.bfloat16).astype(jnp.float32)
        hb = jnp.maximum(xb @ w1b.T, 0.0).astype(jnp.bfloat16).astype(jnp.float32)
        return hb @ w2b.T

    # ---- Test 1: small demo shapes (resident-weight path) -------------------
    N, D_in, H, D_out = 8, 32, 64, 16
    x = jax.random.normal(ks[0], (N, D_in), dtype=jnp.float32)
    b1, b2 = 1.0 / (D_in ** 0.5), 1.0 / (H ** 0.5)
    w1 = jax.random.uniform(ks[1], (H, D_in), minval=-b1, maxval=b1, dtype=jnp.float32)
    w2 = jax.random.uniform(ks[2], (D_out, H), minval=-b2, maxval=b2, dtype=jnp.float32)

    y = two_layer_net(x, w1, w2)
    jax.block_until_ready(y)
    assert y.shape == (N, D_out) and y.dtype == x.dtype
    y_ref = jnp.maximum(x @ w1.T, 0.0) @ w2.T
    assert jnp.allclose(y, y_ref, atol=2e-2, rtol=2e-2)
    assert jnp.allclose(y, ref_bf16(x, w1, w2), atol=1e-3, rtol=1e-2)

    # ---- Test 2: forced H-tiled (streamed-weights) path ----------------------
    N2, D_in2, H2, D_out2 = 32, 128, 256, 128
    x2 = jax.random.normal(ks[3], (N2, D_in2), dtype=jnp.float32)
    b1, b2 = 1.0 / (D_in2 ** 0.5), 1.0 / (H2 ** 0.5)
    w1_2 = jax.random.uniform(ks[4], (H2, D_in2), minval=-b1, maxval=b1, dtype=jnp.float32)
    w2_2 = jax.random.uniform(ks[5], (D_out2, H2), minval=-b2, maxval=b2, dtype=jnp.float32)

    w1t2, w2t2, dims2 = prepare_weights(w1_2, w2_2)
    y2 = two_layer_net_prepared(x2, w1t2, w2t2, dims2, h_tile=128)
    jax.block_until_ready(y2)
    assert y2.shape == (N2, D_out2)
    assert jnp.allclose(y2, ref_bf16(x2, w1_2, w2_2), atol=1e-2, rtol=2e-2)

    # ---- Test 3: bf16 pass-through activations, bf16 output, ragged N tile ---
    N3 = 48
    x3 = jax.random.normal(ks[6], (N3, D_in2), dtype=jnp.float32).astype(jnp.bfloat16)
    y3 = two_layer_net_prepared(x3, w1t2, w2t2, dims2, out_dtype=jnp.bfloat16)
    jax.block_until_ready(y3)
    assert y3.shape == (N3, D_out2) and y3.dtype == jnp.bfloat16
    y3_ref = ref_bf16(x3.astype(jnp.float32), w1_2, w2_2)
    assert jnp.allclose(y3.astype(jnp.float32), y3_ref, atol=5e-2, rtol=5e-2)

    print("KERNEL_OK")
</pallas_src>

<mosaic_0001>
module attributes {stable_mosaic.version = 11 : i64} {
  func.func @_resident_kernel(%arg0: i32, %arg1: memref<16x128xbf16, #tpu.memory_space<vmem>>, %arg2: memref<128x128xbf16, #tpu.memory_space<vmem>>, %arg3: memref<128x128xbf16, #tpu.memory_space<vmem>>, %arg4: memref<16x128xf32, #tpu.memory_space<vmem>>) attributes {dimension_semantics = [#tpu.dimension_semantics<parallel>], iteration_bounds = array<i64: 1>, scalar_prefetch = 0 : i64, scratch_operands = 0 : i64, tpu.core_type = #tpu.core_type<tc>, window_params = [{transform_indices = @transform_0, window_bounds = array<i64: 16, 128>}, {pipeline_mode = #tpu.pipeline_mode<synchronous>, transform_indices = @transform_1, window_bounds = array<i64: 128, 128>}, {pipeline_mode = #tpu.pipeline_mode<synchronous>, transform_indices = @transform_2, window_bounds = array<i64: 128, 128>}, {transform_indices = @transform_3, window_bounds = array<i64: 16, 128>}]} {
    %c0 = arith.constant 0 : index
    %c0_0 = arith.constant 0 : index
    %0 = vector.load %arg1[%c0, %c0_0] : memref<16x128xbf16, #tpu.memory_space<vmem>>, vector<16x128xbf16>
    %c0_1 = arith.constant 0 : index
    %c0_2 = arith.constant 0 : index
    %1 = vector.load %arg2[%c0_1, %c0_2] : memref<128x128xbf16, #tpu.memory_space<vmem>>, vector<128x128xbf16>
    %cst = arith.constant dense<0.000000e+00> : vector<16x128xf32>
    %2 = tpu.matmul %0, %1, %cst {dimension_numbers = #tpu.dot_dimension_numbers<[1], [0], [0], [1], [0, 0, 1, 1], [], []>} : vector<16x128xbf16>, vector<128x128xbf16>, vector<16x128xf32> -> vector<16x128xf32>
    %cst_3 = arith.constant 0.000000e+00 : f32
    %3 = vector.broadcast %cst_3 : f32 to vector<16x128xf32>
    %4 = arith.maximumf %2, %3 : vector<16x128xf32>
    %5 = arith.truncf %4 : vector<16x128xf32> to vector<16x128xbf16>
    %c0_4 = arith.constant 0 : index
    %c0_5 = arith.constant 0 : index
    %6 = vector.load %arg3[%c0_4, %c0_5] : memref<128x128xbf16, #tpu.memory_space<vmem>>, vector<128x128xbf16>
    %cst_6 = arith.constant dense<0.000000e+00> : vector<16x128xf32>
    %7 = tpu.matmul %5, %6, %cst_6 {dimension_numbers = #tpu.dot_dimension_numbers<[1], [0], [0], [1], [0, 0, 1, 1], [], []>} : vector<16x128xbf16>, vector<128x128xbf16>, vector<16x128xf32> -> vector<16x128xf32>
    %c0_7 = arith.constant 0 : index
    %c0_8 = arith.constant 0 : index
    %8 = vector.load %arg4[%c0_7, %c0_8] : memref<16x128xf32, #tpu.memory_space<vmem>>, vector<16x128xf32>
    tpu.vector_store %arg4[%c0_7, %c0_8], %7 {strides = array<i32>} : memref<16x128xf32, #tpu.memory_space<vmem>>, vector<16x128xf32>,
    return
  }
  func.func @transform_0(%arg0: i32) -> (i32, i32) {
    %c0_i32 = arith.constant 0 : i32
    %c0_i32_0 = arith.constant 0 : i32
    return %arg0, %c0_i32 : i32, i32
  }
  func.func @transform_1(%arg0: i32) -> (i32, i32) {
    %c0_i32 = arith.constant 0 : i32
    %c0_i32_0 = arith.constant 0 : i32
    %c0_i32_1 = arith.constant 0 : i32
    return %c0_i32, %c0_i32_0 : i32, i32
  }
  func.func @transform_2(%arg0: i32) -> (i32, i32) {
    %c0_i32 = arith.constant 0 : i32
    %c0_i32_0 = arith.constant 0 : i32
    %c0_i32_1 = arith.constant 0 : i32
    return %c0_i32, %c0_i32_0 : i32, i32
  }
  func.func @transform_3(%arg0: i32) -> (i32, i32) {
    %c0_i32 = arith.constant 0 : i32
    %c0_i32_0 = arith.constant 0 : i32
    return %arg0, %c0_i32 : i32, i32
  }
}

module attributes {stable_mosaic.version = 11 : i64} {
  func.func @_resident_kernel(%arg0: i32, %arg1: memref<16x128xbf16, #tpu.memory_space<vmem>>, %arg2: memref<128x128xbf16, #tpu.memory_space<vmem>>, %arg3: memref<128x128xbf16, #tpu.memory_space<vmem>>, %arg4: memref<16x128xf32, #tpu.memory_space<vmem>>) attributes {dimension_semantics = [#tpu.dimension_semantics<parallel>], iteration_bounds = array<i64: 1>, scalar_prefetch = 0 : i64, scratch_operands = 0 : i64, tpu.core_type = #tpu.core_type<tc>, window_params = [{transform_indices = @transform_0, window_bounds = array<i64: 16, 128>}, {pipeline_mode = #tpu.pipeline_mode<synchronous>, transform_indices = @transform_1, window_bounds = array<i64: 128, 128>}, {pipeline_mode = #tpu.pipeline_mode<synchronous>, transform_indices = @transform_2, window_bounds = array<i64: 128, 128>}, {transform_indices = @transform_3, window_bounds = array<i64: 16, 128>}]} {
    %c0 = arith.constant 0 : index
    %c0_0 = arith.constant 0 : index
    %0 = vector.load %arg1[%c0, %c0_0] : memref<16x128xbf16, #tpu.memory_space<vmem>>, vector<16x128xbf16>
    %c0_1 = arith.constant 0 : index
    %c0_2 = arith.constant 0 : index
    %1 = vector.load %arg2[%c0_1, %c0_2] : memref<128x128xbf16, #tpu.memory_space<vmem>>, vector<128x128xbf16>
    %cst = arith.constant dense<0.000000e+00> : vector<16x128xf32>
    %2 = tpu.matmul %0, %1, %cst {dimension_numbers = #tpu.dot_dimension_numbers<[1], [0], [0], [1], [0, 0, 1, 1], [], []>} : vector<16x128xbf16>, vector<128x128xbf16>, vector<16x128xf32> -> vector<16x128xf32>
    %cst_3 = arith.constant 0.000000e+00 : f32
    %3 = vector.broadcast %cst_3 : f32 to vector<16x128xf32>
    %4 = arith.maximumf %2, %3 : vector<16x128xf32>
    %5 = arith.truncf %4 : vector<16x128xf32> to vector<16x128xbf16>
    %c0_4 = arith.constant 0 : index
    %c0_5 = arith.constant 0 : index
    %6 = vector.load %arg3[%c0_4, %c0_5] : memref<128x128xbf16, #tpu.memory_space<vmem>>, vector<128x128xbf16>
    %cst_6 = arith.constant dense<0.000000e+00> : vector<16x128xf32>
    %7 = tpu.matmul %5, %6, %cst_6 {dimension_numbers = #tpu.dot_dimension_numbers<[1], [0], [0], [1], [0, 0, 1, 1], [], []>} : vector<16x128xbf16>, vector<128x128xbf16>, vector<16x128xf32> -> vector<16x128xf32>
    %c0_7 = arith.constant 0 : index
    %c0_8 = arith.constant 0 : index
    %8 = vector.load %arg4[%c0_7, %c0_8] : memref<16x128xf32, #tpu.memory_space<vmem>>, vector<16x128xf32>
    tpu.vector_store %arg4[%c0_7, %c0_8], %7 {strides = array<i32>} : memref<16x128xf32, #tpu.memory_space<vmem>>, vector<16x128xf32>,
    return
  }
  func.func @transform_0(%arg0: i32) -> (i32, i32) {
    %c0_i32 = arith.constant 0 : i32
    %c0_i32_0 = arith.constant 0 : i32
    return %arg0, %c0_i32 : i32, i32
  }
  func.func @transform_1(%arg0: i32) -> (i32, i32) {
    %c0_i32 = arith.constant 0 : i32
    %c0_i32_0 = arith.constant 0 : i32
    %c0_i32_1 = arith.constant 0 : i32
    return %c0_i32, %c0_i32_0 : i32, i32
  }
  func.func @transform_2(%arg0: i32) -> (i32, i32) {
    %c0_i32 = arith.constant 0 : i32
    %c0_i32_0 = arith.constant 0 : i32
    %c0_i32_1 = arith.constant 0 : i32
    return %c0_i32, %c0_i32_0 : i32, i32
  }
  func.func @transform_3(%arg0: i32) -> (i32, i32) {
    %c0_i32 = arith.constant 0 : i32
    %c0_i32_0 = arith.constant 0 : i32
    return %arg0, %c0_i32 : i32, i32
  }
}

</mosaic_0001>

<bundles_post_ra>
// kernel: tpu_custom_call.1
= control target key start
LH: loop header
LB: loop body
LE: loop exit
PB: predicated region body
PF: predicated region fallthrough
CT: control target
= control target key end

     0   :  { %8 = vsyncpa [#allocation3], 0  ;;  %s528_s0 = inlined_call_operand.hbm [shape: bf16[16,128], index: 0, kind: input, shape index: {}]   ;;  %s529_s1 = inlined_call_operand.hbm [shape: bf16[128,128], index: 1, kind: input, shape index: {}]   ;;  %s530_s2 = inlined_call_operand.hbm [shape: bf16[128,128], index: 2, kind: input, shape index: {}]   ;;  %s531_s3 = inlined_call_operand.hbm [shape: f32[16,128], index: 3, kind: output, shape index: {}]  }
   0x1   :  { %9 = vsyncpa [#allocation6], 0 }
   0x2   :  { %10 = vsyncpa [#allocation4], 0  ;;  %s486_s12 = smov [#allocation5]   ;;  %s487_s14 = smov [#allocation2]  }
   0x3   :  { %s28_s13 = sshll.u32 %s486_s12, 4  ;;  %s16_s15 = sshll.u32 %s487_s14, 4  ;;  %s29_s13 = int_to_ptr.vmem [resolvable:$true] %s28_s13  ;;  %s17_s15 = int_to_ptr.vmem [resolvable:$true] %s16_s15 }
   0x4   :  { %s408_s16 = scalar_lea.vmem %s29_s13, 1024  ;;  %p413_p1 = scmp.lt.s32.totalorder %s29_s13, %s29_s13 }
   0x5   :  { %p409_p0 = scmp.ne.s32.totalorder %s29_s13, %s408_s16  ;;  %p414_p2 = scmp.lt.s32.totalorder %s408_s16, %s408_s16 }
   0x7   :  { %p415_p3 = por %p414_p2, %p413_p1 }
   0x9   :  { %p416_p4 = pnand %p415_p3, %p409_p0 }
   0xb   :  { %419 = shalt.err (!%p416_p4)
}
   0xc   :  { %s488_s17 = smov 64   ;;  %s489_s18 = smov 4  }
   0xd   :  { %34 = dma.hbm_to_vmem [thread:$0]  %s529_s1, 1024, %s29_s13, [#allocation6], %s488_s17, %s488_s17, %s489_s18  }
   0xe   :  { %s428_s21 = scalar_lea.vmem %s17_s15, 128  ;;  %p433_p6 = scmp.lt.s32.totalorder %s17_s15, %s17_s15 }
   0xf   :  { %p429_p5 = scmp.ne.s32.totalorder %s17_s15, %s428_s21  ;;  %p434_p7 = scmp.lt.s32.totalorder %s428_s21, %s428_s21 }
  0x11   :  { %p435_p8 = por %p434_p7, %p433_p6 }
  0x13   :  { %p436_p9 = pnand %p435_p8, %p429_p5 }
  0x15   :  { %439 = shalt.err (!%p436_p9)
}
  0x16   :  { %22 = dma.hbm_to_vmem [thread:$0]  %s528_s0, 128, %s17_s15, [#allocation3], %s488_s17, %s488_s17, %s489_s18  }
  0x17   :  { %s490_s24 = smov [#allocation7]  }
  0x18   :  { %s40_s25 = sshll.u32 %s490_s24, 4  ;;  %s41_s25 = int_to_ptr.vmem [resolvable:$true] %s40_s25 }
  0x19   :  { %s448_s26 = scalar_lea.vmem %s41_s25, 1024  ;;  %p453_p11 = scmp.lt.s32.totalorder %s41_s25, %s41_s25 }
  0x1a   :  { %p449_p10 = scmp.ne.s32.totalorder %s41_s25, %s448_s26  ;;  %p454_p12 = scmp.lt.s32.totalorder %s448_s26, %s448_s26 }
  0x1c   :  { %p455_p13 = por %p454_p12, %p453_p11 }
  0x1e   :  { %p456_p0 = pnand %p455_p13, %p449_p10 }
  0x20   :  { %459 = shalt.err (!%p456_p0)
}
  0x21   :  { %46 = dma.hbm_to_vmem [thread:$0]  %s530_s2, 1024, %s41_s25, [#allocation6], %s488_s17, %s488_s17, %s489_s18  }
  0x22   :  { %480 = dma.done.wait [#allocation3], 128  }
  0x23   :  { %481 = vsyncadd [#allocation3], 4294967168 }
  0x24   :  { %482 = dma.done.wait [#allocation6], 2048  }
  0x25   :  { %483 = vsyncadd [#allocation6], 4294965248  ;;  %v491_v0 = vmov 0.0   ;;  %vm492_vm0 = vmmov 0   ;;  %v383_v1 = vld [vmem:[#allocation5 + $0x38] sm:$0xff]   ;;  %v384_v2 = vld [vmem:[#allocation5 + $0x30] sm:$0xff]  }
  0x26   :  { %333 = vmatprep.subr.bf16.mxu0 %v491_v0  ;;  %349 = vmatprep.mubr.msk.bf16.mxu0 %vm492_vm0, %v491_v0  ;;  %v385_v3 = vld [vmem:[#allocation5 + $0x28] sm:$0xff]   ;;  %v392_v4 = vld [vmem:[#allocation7 + $0x38] sm:$0xff]   ;;  %v386_v5 = vld [vmem:[#allocation5 + $0x20] sm:$0xff]   ;;  %s493_s0 = smov [#allocation8]  }
  0x27   :  { %353 = vmatprep.subr.bf16.mxu1 %v491_v0  ;;  %369 = vmatprep.mubr.msk.bf16.mxu1 %vm492_vm0, %v491_v0  ;;  %v393_v6 = vld [vmem:[#allocation7 + $0x30] sm:$0xff]   ;;  %v387_v7 = vld [vmem:[#allocation5 + $0x18] sm:$0xff]   ;;  %v394_v8 = vld [vmem:[#allocation7 + $0x28] sm:$0xff]   ;;  %s285_s2 = sshll.u32 %s493_s0, 4  ;;  %s286_s2 = int_to_ptr.vmem [resolvable:$true] %s285_s2 }
  0x28   :  { %334 = vmatpush3.bf16.msra.mxu0 %v383_v1  ;;  %354 = vmatpush3.bf16.msra.mxu1 %v392_v4  ;;  %v388_v9 = vld [vmem:[#allocation5 + $0x10] sm:$0xff]   ;;  %v395_v10 = vld [vmem:[#allocation7 + $0x20] sm:$0xff]   ;;  %v389_v11 = vld [vmem:[#allocation5 + $0x8] sm:$0xff]   ;;  %s460_s28 = scalar_lea.vmem %s286_s2, 256  ;;  %p465_p2 = scmp.lt.s32.totalorder %s286_s2, %s286_s2 }
  0x29   :  { %335 = vmatprep.subr.bf16.mxu0 %v491_v0  ;;  %355 = vmatprep.subr.bf16.mxu1 %v491_v0  ;;  %v396_v12 = vld [vmem:[#allocation7 + $0x18] sm:$0xff]   ;;  %v390_v13 = vld [vmem:[#allocation5] sm:$0xff]   ;;  %v397_v14 = vld [vmem:[#allocation7 + $0x10] sm:$0xff]   ;;  %p461_p1 = scmp.ne.s32.totalorder %s286_s2, %s460_s28  ;;  %p466_p3 = scmp.lt.s32.totalorder %s460_s28, %s460_s28 }
  0x2a   :  { %v391_v15 = vld [vmem:[#allocation2] sm:$0xff]   ;;  %v398_v16 = vld [vmem:[#allocation7 + $0x8] sm:$0xff]   ;;  %v399_v17 = vld [vmem:[#allocation7] sm:$0xff]  }
  0x2b   :  { %p467_p4 = por %p466_p3, %p465_p2 }
  0x2c   :  { %336 = vmatpush3.bf16.msra.mxu0 %v384_v2  ;;  %356 = vmatpush3.bf16.msra.mxu1 %v393_v6 }
  0x2d   :  { %337 = vmatprep.subr.bf16.mxu0 %v491_v0  ;;  %357 = vmatprep.subr.bf16.mxu1 %v491_v0  ;;  %p468_p5 = pnand %p467_p4, %p461_p1 }
  0x30   :  { %338 = vmatpush3.bf16.msra.mxu0 %v385_v3  ;;  %358 = vmatpush3.bf16.msra.mxu1 %v394_v8 }
  0x31   :  { %339 = vmatprep.subr.bf16.mxu0 %v491_v0  ;;  %359 = vmatprep.subr.bf16.mxu1 %v491_v0 }
  0x34   :  { %340 = vmatpush3.bf16.msra.mxu0 %v386_v5  ;;  %360 = vmatpush3.bf16.msra.mxu1 %v395_v10 }
  0x35   :  { %341 = vmatprep.subr.bf16.mxu0 %v491_v0  ;;  %361 = vmatprep.subr.bf16.mxu1 %v491_v0 }
  0x38   :  { %342 = vmatpush3.bf16.msra.mxu0 %v387_v7  ;;  %362 = vmatpush3.bf16.msra.mxu1 %v396_v12 }
  0x39   :  { %343 = vmatprep.subr.bf16.mxu0 %v491_v0  ;;  %363 = vmatprep.subr.bf16.mxu1 %v491_v0 }
  0x3c   :  { %344 = vmatpush3.bf16.msra.mxu0 %v388_v9  ;;  %364 = vmatpush3.bf16.msra.mxu1 %v397_v14 }
  0x3d   :  { %345 = vmatprep.subr.bf16.mxu0 %v491_v0  ;;  %365 = vmatprep.subr.bf16.mxu1 %v491_v0 }
  0x40   :  { %346 = vmatpush3.bf16.msra.mxu0 %v389_v11  ;;  %366 = vmatpush3.bf16.msra.mxu1 %v398_v16 }
  0x41   :  { %347 = vmatprep.subr.bf16.mxu0 %v491_v0  ;;  %367 = vmatprep.subr.bf16.mxu1 %v491_v0 }
  0x44   :  { %348 = vmatpush3.bf16.msra.mxu0 %v390_v13  ;;  %368 = vmatpush3.bf16.msra.mxu1 %v399_v17 }
  0x47   :  { %350 = vmatmul.mubr.bf16.vlgmr.msra.gmra.mxu0 %v391_v15 }
 0x107   :  { %v163_v18 = vpop.f32.mrf.mxu0 }
 0x108   :  { %v170_v21 = vmax.f32 %v163_v18, 0.0 }
 0x109   :  { %v351_v19 = vpop.f32.mrf.mxu0 }
 0x10b   :  { %v166_v20 = vpop.f32.mrf.mxu0 }
 0x10c   :  { %v171_v22 = vmax.f32 %v166_v20, 0.0 }
 0x10d   :  { %v352_v23 = vpop.f32.mrf.mxu0 }
 0x10e   :  { %v172_v24 = vpack.c.bf16 %v171_v22, %v170_v21 }
 0x110   :  { %370 = vmatmul.mubr.bf16.vlgmr.msra.gmra.mxu1 %v172_v24 }
 0x1d0   :  { %v271_v25 = vpop.f32.mrf.mxu1 }
 0x1d1   :  { %278 = vst [vmem:[#allocation8] sm:$0xff] %v271_v25 }
 0x1d2   :  { %v371_v26 = vpop.f32.mrf.mxu1 }
 0x1d4   :  { %v274_v27 = vpop.f32.mrf.mxu1 }
 0x1d5   :  { %279 = vst [vmem:[#allocation8 + $0x8] sm:$0xff] %v274_v27 }
 0x1d6   :  { %v372_v28 = vpop.f32.mrf.mxu1 }
 0x1d7   :  { %471 = shalt.err (!%p468_p5)
}
 0x1d8   :  { %s494_s29 = smov 128   ;;  %s495_s30 = smov 8  }
 0x1d9   :  { %291 = dma.vmem_to_hbm [thread:$0]  %s286_s2, 256, %s531_s3, [#allocation4], %s494_s29, %s494_s29, %s495_s30  }
 0x1da   :  { %484 = dma.done.wait [#allocation4], 256  }
 0x1db   :  { %485 = vsyncadd [#allocation4], 4294967040 }
 0x1dc   :  { %295 = vsyncpa [#allocation3], 1 }
 0x1dd   :  { %296 = vsyncpa [#allocation6], 1 }
 0x1de   :  { %297 = vsyncpa [#allocation4], 1 }

// kernel: tpu_custom_call.1
= control target key start
LH: loop header
LB: loop body
LE: loop exit
PB: predicated region body
PF: predicated region fallthrough
CT: control target
= control target key end

     0   :  { %8 = vsyncpa [#allocation3], 0  ;;  %s528_s0 = inlined_call_operand.hbm [shape: bf16[16,128], index: 0, kind: input, shape index: {}]   ;;  %s529_s1 = inlined_call_operand.hbm [shape: bf16[128,128], index: 1, kind: input, shape index: {}]   ;;  %s530_s2 = inlined_call_operand.hbm [shape: bf16[128,128], index: 2, kind: input, shape index: {}]   ;;  %s531_s3 = inlined_call_operand.hbm [shape: f32[16,128], index: 3, kind: output, shape index: {}]  }
   0x1   :  { %9 = vsyncpa [#allocation6], 0 }
   0x2   :  { %10 = vsyncpa [#allocation4], 0  ;;  %s486_s12 = smov [#allocation5]   ;;  %s487_s14 = smov [#allocation2]  }
   0x3   :  { %s28_s13 = sshll.u32 %s486_s12, 4  ;;  %s16_s15 = sshll.u32 %s487_s14, 4  ;;  %s29_s13 = int_to_ptr.vmem [resolvable:$true] %s28_s13  ;;  %s17_s15 = int_to_ptr.vmem [resolvable:$true] %s16_s15 }
   0x4   :  { %s408_s16 = scalar_lea.vmem %s29_s13, 1024  ;;  %p413_p1 = scmp.lt.s32.totalorder %s29_s13, %s29_s13 }
   0x5   :  { %p409_p0 = scmp.ne.s32.totalorder %s29_s13, %s408_s16  ;;  %p414_p2 = scmp.lt.s32.totalorder %s408_s16, %s408_s16 }
   0x7   :  { %p415_p3 = por %p414_p2, %p413_p1 }
   0x9   :  { %p416_p4 = pnand %p415_p3, %p409_p0 }
   0xb   :  { %419 = shalt.err (!%p416_p4)
}
   0xc   :  { %s488_s17 = smov 64   ;;  %s489_s18 = smov 4  }
   0xd   :  { %34 = dma.hbm_to_vmem [thread:$0]  %s529_s1, 1024, %s29_s13, [#allocation6], %s488_s17, %s488_s17, %s489_s18  }
   0xe   :  { %s428_s21 = scalar_lea.vmem %s17_s15, 128  ;;  %p433_p6 = scmp.lt.s32.totalorder %s17_s15, %s17_s15 }
   0xf   :  { %p429_p5 = scmp.ne.s32.totalorder %s17_s15, %s428_s21  ;;  %p434_p7 = scmp.lt.s32.totalorder %s428_s21, %s428_s21 }
  0x11   :  { %p435_p8 = por %p434_p7, %p433_p6 }
  0x13   :  { %p436_p9 = pnand %p435_p8, %p429_p5 }
  0x15   :  { %439 = shalt.err (!%p436_p9)
}
  0x16   :  { %22 = dma.hbm_to_vmem [thread:$0]  %s528_s0, 128, %s17_s15, [#allocation3], %s488_s17, %s488_s17, %s489_s18  }
  0x17   :  { %s490_s24 = smov [#allocation7]  }
  0x18   :  { %s40_s25 = sshll.u32 %s490_s24, 4  ;;  %s41_s25 = int_to_ptr.vmem [resolvable:$true] %s40_s25 }
  0x19   :  { %s448_s26 = scalar_lea.vmem %s41_s25, 1024  ;;  %p453_p11 = scmp.lt.s32.totalorder %s41_s25, %s41_s25 }
  0x1a   :  { %p449_p10 = scmp.ne.s32.totalorder %s41_s25, %s448_s26  ;;  %p454_p12 = scmp.lt.s32.totalorder %s448_s26, %s448_s26 }
  0x1c   :  { %p455_p13 = por %p454_p12, %p453_p11 }
  0x1e   :  { %p456_p0 = pnand %p455_p13, %p449_p10 }
  0x20   :  { %459 = shalt.err (!%p456_p0)
}
  0x21   :  { %46 = dma.hbm_to_vmem [thread:$0]  %s530_s2, 1024, %s41_s25, [#allocation6], %s488_s17, %s488_s17, %s489_s18  }
  0x22   :  { %480 = dma.done.wait [#allocation3], 128  }
  0x23   :  { %481 = vsyncadd [#allocation3], 4294967168 }
  0x24   :  { %482 = dma.done.wait [#allocation6], 2048  }
  0x25   :  { %483 = vsyncadd [#allocation6], 4294965248  ;;  %v491_v0 = vmov 0.0   ;;  %vm492_vm0 = vmmov 0   ;;  %v383_v1 = vld [vmem:[#allocation5 + $0x38] sm:$0xff]   ;;  %v384_v2 = vld [vmem:[#allocation5 + $0x30] sm:$0xff]  }
  0x26   :  { %333 = vmatprep.subr.bf16.mxu0 %v491_v0  ;;  %349 = vmatprep.mubr.msk.bf16.mxu0 %vm492_vm0, %v491_v0  ;;  %v385_v3 = vld [vmem:[#allocation5 + $0x28] sm:$0xff]   ;;  %v392_v4 = vld [vmem:[#allocation7 + $0x38] sm:$0xff]   ;;  %v386_v5 = vld [vmem:[#allocation5 + $0x20] sm:$0xff]   ;;  %s493_s0 = smov [#allocation8]  }
  0x27   :  { %353 = vmatprep.subr.bf16.mxu1 %v491_v0  ;;  %369 = vmatprep.mubr.msk.bf16.mxu1 %vm492_vm0, %v491_v0  ;;  %v393_v6 = vld [vmem:[#allocation7 + $0x30] sm:$0xff]   ;;  %v387_v7 = vld [vmem:[#allocation5 + $0x18] sm:$0xff]   ;;  %v394_v8 = vld [vmem:[#allocation7 + $0x28] sm:$0xff]   ;;  %s285_s2 = sshll.u32 %s493_s0, 4  ;;  %s286_s2 = int_to_ptr.vmem [resolvable:$true] %s285_s2 }
  0x28   :  { %334 = vmatpush3.bf16.msra.mxu0 %v383_v1  ;;  %354 = vmatpush3.bf16.msra.mxu1 %v392_v4  ;;  %v388_v9 = vld [vmem:[#allocation5 + $0x10] sm:$0xff]   ;;  %v395_v10 = vld [vmem:[#allocation7 + $0x20] sm:$0xff]   ;;  %v389_v11 = vld [vmem:[#allocation5 + $0x8] sm:$0xff]   ;;  %s460_s28 = scalar_lea.vmem %s286_s2, 256  ;;  %p465_p2 = scmp.lt.s32.totalorder %s286_s2, %s286_s2 }
  0x29   :  { %335 = vmatprep.subr.bf16.mxu0 %v491_v0  ;;  %355 = vmatprep.subr.bf16.mxu1 %v491_v0  ;;  %v396_v12 = vld [vmem:[#allocation7 + $0x18] sm:$0xff]   ;;  %v390_v13 = vld [vmem:[#allocation5] sm:$0xff]   ;;  %v397_v14 = vld [vmem:[#allocation7 + $0x10] sm:$0xff]   ;;  %p461_p1 = scmp.ne.s32.totalorder %s286_s2, %s460_s28  ;;  %p466_p3 = scmp.lt.s32.totalorder %s460_s28, %s460_s28 }
  0x2a   :  { %v391_v15 = vld [vmem:[#allocation2] sm:$0xff]   ;;  %v398_v16 = vld [vmem:[#allocation7 + $0x8] sm:$0xff]   ;;  %v399_v17 = vld [vmem:[#allocation7] sm:$0xff]  }
  0x2b   :  { %p467_p4 = por %p466_p3, %p465_p2 }
  0x2c   :  { %336 = vmatpush3.bf16.msra.mxu0 %v384_v2  ;;  %356 = vmatpush3.bf16.msra.mxu1 %v393_v6 }
  0x2d   :  { %337 = vmatprep.subr.bf16.mxu0 %v491_v0  ;;  %357 = vmatprep.subr.bf16.mxu1 %v491_v0  ;;  %p468_p5 = pnand %p467_p4, %p461_p1 }
  0x30   :  { %338 = vmatpush3.bf16.msra.mxu0 %v385_v3  ;;  %358 = vmatpush3.bf16.msra.mxu1 %v394_v8 }
  0x31   :  { %339 = vmatprep.subr.bf16.mxu0 %v491_v0  ;;  %359 = vmatprep.subr.bf16.mxu1 %v491_v0 }
  0x34   :  { %340 = vmatpush3.bf16.msra.mxu0 %v386_v5  ;;  %360 = vmatpush3.bf16.msra.mxu1 %v395_v10 }
  0x35   :  { %341 = vmatprep.subr.bf16.mxu0 %v491_v0  ;;  %361 = vmatprep.subr.bf16.mxu1 %v491_v0 }
  0x38   :  { %342 = vmatpush3.bf16.msra.mxu0 %v387_v7  ;;  %362 = vmatpush3.bf16.msra.mxu1 %v396_v12 }
  0x39   :  { %343 = vmatprep.subr.bf16.mxu0 %v491_v0  ;;  %363 = vmatprep.subr.bf16.mxu1 %v491_v0 }
  0x3c   :  { %344 = vmatpush3.bf16.msra.mxu0 %v388_v9  ;;  %364 = vmatpush3.bf16.msra.mxu1 %v397_v14 }
  0x3d   :  { %345 = vmatprep.subr.bf16.mxu0 %v491_v0  ;;  %365 = vmatprep.subr.bf16.mxu1 %v491_v0 }
  0x40   :  { %346 = vmatpush3.bf16.msra.mxu0 %v389_v11  ;;  %366 = vmatpush3.bf16.msra.mxu1 %v398_v16 }
  0x41   :  { %347 = vmatprep.subr.bf16.mxu0 %v491_v0  ;;  %367 = vmatprep.subr.bf16.mxu1 %v491_v0 }
  0x44   :  { %348 = vmatpush3.bf16.msra.mxu0 %v390_v13  ;;  %368 = vmatpush3.bf16.msra.mxu1 %v399_v17 }
  0x47   :  { %350 = vmatmul.mubr.bf16.vlgmr.msra.gmra.mxu0 %v391_v15 }
 0x107   :  { %v163_v18 = vpop.f32.mrf.mxu0 }
 0x108   :  { %v170_v21 = vmax.f32 %v163_v18, 0.0 }
 0x109   :  { %v351_v19 = vpop.f32.mrf.mxu0 }
 0x10b   :  { %v166_v20 = vpop.f32.mrf.mxu0 }
 0x10c   :  { %v171_v22 = vmax.f32 %v166_v20, 0.0 }
 0x10d   :  { %v352_v23 = vpop.f32.mrf.mxu0 }
 0x10e   :  { %v172_v24 = vpack.c.bf16 %v171_v22, %v170_v21 }
 0x110   :  { %370 = vmatmul.mubr.bf16.vlgmr.msra.gmra.mxu1 %v172_v24 }
 0x1d0   :  { %v271_v25 = vpop.f32.mrf.mxu1 }
 0x1d1   :  { %278 = vst [vmem:[#allocation8] sm:$0xff] %v271_v25 }
 0x1d2   :  { %v371_v26 = vpop.f32.mrf.mxu1 }
 0x1d4   :  { %v274_v27 = vpop.f32.mrf.mxu1 }
 0x1d5   :  { %279 = vst [vmem:[#allocation8 + $0x8] sm:$0xff] %v274_v27 }
 0x1d6   :  { %v372_v28 = vpop.f32.mrf.mxu1 }
 0x1d7   :  { %471 = shalt.err (!%p468_p5)
}
 0x1d8   :  { %s494_s29 = smov 128   ;;  %s495_s30 = smov 8  }
 0x1d9   :  { %291 = dma.vmem_to_hbm [thread:$0]  %s286_s2, 256, %s531_s3, [#allocation4], %s494_s29, %s494_s29, %s495_s30  }
 0x1da   :  { %484 = dma.done.wait [#allocation4], 256  }
 0x1db   :  { %485 = vsyncadd [#allocation4], 4294967040 }
 0x1dc   :  { %295 = vsyncpa [#allocation3], 1 }
 0x1dd   :  { %296 = vsyncpa [#allocation6], 1 }
 0x1de   :  { %297 = vsyncpa [#allocation4], 1 }

</bundles_post_ra>
